<compile_context>
chip_gen: v7x
topology: tpu7x:2x2x1
jax: 0.10.0
libtpu: 0.0.40
codegen_flags: <defaults>
</compile_context>

<pallas_src>
from functools import partial

import numpy as np
import jax
import jax.numpy as jnp
from jax.experimental import pallas as pl
from jax.experimental.pallas import tpu as pltpu


def _interp_matrix(in_size: int, out_size: int) -> jnp.ndarray:
    """(out_size, in_size) bilinear interpolation matrix, align_corners=True."""
    if out_size == 1:
        src = np.zeros((1,), np.float64)
    else:
        src = np.arange(out_size, dtype=np.float64) * ((in_size - 1) / (out_size - 1))
    i0 = np.clip(np.floor(src).astype(np.int64), 0, in_size - 1)
    i1 = np.minimum(i0 + 1, in_size - 1)
    frac = (src - i0).astype(np.float32)
    w = np.zeros((out_size, in_size), np.float32)
    rows = np.arange(out_size)
    np.add.at(w, (rows, i0), 1.0 - frac)
    np.add.at(w, (rows, i1), frac)
    return jnp.asarray(w)


def _pick_row_tile(s: int) -> int:
    """Largest row-tile that divides S, is a multiple of 8 and <= ~128 (else S)."""
    cap = min(128, max(8, s // 2))
    for ts in range(cap, 7, -1):
        if s % ts == 0 and ts % 8 == 0:
            return ts
    return s


def _mapmaker_kernel(v_ref, p_ref, wct_ref, wr_ref, o_ref, low_ref, mid_ref):
    # v_ref:   (1, C, H*W)   scale-summed vision features, bf16 (lane-dense)
    # p_ref:   (K, C)        prompt features^T, pre-scaled by 1/num_scales, bf16
    # wct_ref: (W, S)        width interpolation weights (transposed), f32
    # wr_ref:  (TS, H)       height interpolation weights for this row tile, f32
    # o_ref:   (1, K, TS, S) NCHW softmax(anomaly map) tile, f32
    # low_ref: (K, H, W)     scratch: low-res per-class anomaly map (persistent)
    # mid_ref: (K, H, S)     scratch: width-interpolated map (persistent across row tiles)
    K, H, W = low_ref.shape
    S = mid_ref.shape[2]

    # Per batch element (first row tile): prompt matmul + width interpolation.
    # Both scratches are fully overwritten here, so no stale data can leak across
    # batch elements.
    @pl.when(pl.program_id(1) == 0)
    def _():
        # Single MXU matmul over the flattened spatial dim (lane-dense).
        low = jnp.dot(p_ref[...], v_ref[0], preferred_element_type=jnp.float32)  # (K, H*W)
        # Split H*W lanes back into (H, W) with H tiny static row stores
        # (avoids a lane-splitting reshape).
        for h in range(H):
            low_ref[:, h, :] = low[:, h * W:(h + 1) * W]
        # Width-first interpolation: every output is lane-dense at S.
        wct = wct_ref[...]
        for k in range(K):
            mid_ref[k] = jnp.dot(low_ref[k], wct, preferred_element_type=jnp.float32)  # (H, S)

    # Per row tile: height interpolation + channel softmax + NCHW store.
    wr = wr_ref[...]                                                              # (TS, H)
    ups = [jnp.dot(wr, mid_ref[k], preferred_element_type=jnp.float32) for k in range(K)]

    if K == 2:
        # Exact 2-class softmax via logistic: fewer temporaries, rows sum to exactly 1.
        p0 = 1.0 / (1.0 + jnp.exp(ups[1] - ups[0]))
        o_ref[0, 0] = p0.astype(o_ref.dtype)
        o_ref[0, 1] = (1.0 - p0).astype(o_ref.dtype)
    else:
        m = ups[0]
        for k in range(1, K):
            m = jnp.maximum(m, ups[k])
        es = [jnp.exp(u - m) for u in ups]
        denom = es[0]
        for k in range(1, K):
            denom = denom + es[k]
        inv = 1.0 / denom
        for k in range(K):
            o_ref[0, k] = (es[k] * inv).astype(o_ref.dtype)


@partial(jax.jit, static_argnames=("image_size",))
def mapmaker_forward(vision_adapter_features, prompt_adapter_features, *, image_size):
    """vision_adapter_features: list of (B, H, W, C); prompt_adapter_features: (C, K)."""
    num_scales = len(vision_adapter_features)
    B, H, W, C = vision_adapter_features[0].shape
    K = prompt_adapter_features.shape[1]
    S = int(image_size)

    # Scale-sum (mean's 1/num_scales is folded into the prompt matrix below); the
    # adds + transpose + bf16 cast fuse into a single XLA pass producing the
    # lane-dense (B, C, H*W) bf16 tensor the kernel consumes.
    v_sum = vision_adapter_features[0]
    for f in vision_adapter_features[1:]:
        v_sum = v_sum + f
    v = jnp.transpose(v_sum, (0, 3, 1, 2)).reshape(B, C, H * W).astype(jnp.bfloat16)

    p_t = (jnp.transpose(prompt_adapter_features, (1, 0)) * (1.0 / num_scales)
           ).astype(jnp.bfloat16)                                   # (K, C)

    wr = _interp_matrix(H, S)                                        # (S, H) f32
    wct = _interp_matrix(W, S).T                                     # (W, S) f32

    TS = _pick_row_tile(S)
    num_row_tiles = S // TS

    out = pl.pallas_call(
        _mapmaker_kernel,
        out_shape=jax.ShapeDtypeStruct((B, K, S, S), jnp.float32),
        grid_spec=pltpu.PrefetchScalarGridSpec(
            num_scalar_prefetch=0,
            grid=(B, num_row_tiles),
            in_specs=[
                pl.BlockSpec((1, C, H * W), lambda b, si: (b, 0, 0)),   # stays resident over si
                pl.BlockSpec((K, C), lambda b, si: (0, 0)),
                pl.BlockSpec((W, S), lambda b, si: (0, 0)),
                pl.BlockSpec((TS, H), lambda b, si: (si, 0)),
            ],
            out_specs=pl.BlockSpec((1, K, TS, S), lambda b, si: (b, 0, si, 0)),
            scratch_shapes=[
                pltpu.VMEM((K, H, W), jnp.float32),
                pltpu.VMEM((K, H, S), jnp.float32),
            ],
        ),
        compiler_params=pltpu.CompilerParams(
            dimension_semantics=("parallel", "arbitrary"),
        ),
    )(v, p_t, wct, wr)

    # Output is already NCHW (B, K, S, S); no wrapper-side transpose.
    return out


def _reference_forward(vision_adapter_features, prompt_adapter_features, image_size):
    """Pure-JAX f32 reference mirroring the PyTorch module."""
    maps = []
    for f in vision_adapter_features:
        B, H, W, C = f.shape
        a = (f.reshape(B, H * W, C).astype(jnp.float32)
             @ prompt_adapter_features.astype(jnp.float32)).reshape(B, H, W, -1)
        maps.append(jnp.transpose(a, (0, 3, 1, 2)))
    a = jnp.mean(jnp.stack(maps, axis=0), axis=0)                    # (B, K, H, W)
    wr = _interp_matrix(a.shape[2], image_size)
    wc = _interp_matrix(a.shape[3], image_size)
    up = jnp.einsum("rh,bkhw,sw->bkrs", wr, a, wc)
    return jax.nn.softmax(up, axis=1)


if __name__ == "__main__":
    key = jax.random.PRNGKey(0)
    B, H, W, C, K = 2, 16, 16, 32, 2
    num_scales = 3
    image_size = 32

    keys = jax.random.split(key, num_scales + 1)
    vision_feats = [
        jax.random.normal(keys[i], (B, H, W, C), dtype=jnp.float32)
        for i in range(num_scales)
    ]
    prompt_feats = jax.random.normal(keys[-1], (C, K), dtype=jnp.float32)

    out = mapmaker_forward(vision_feats, prompt_feats, image_size=image_size)
    out = jax.block_until_ready(out)

    assert out.shape == (B, K, image_size, image_size), out.shape

    ref = _reference_forward(vision_feats, prompt_feats, image_size)
    # Tolerance 2e-2: kernel feeds bf16 vision/prompt features (f32 accumulation);
    # reference is pure f32; softmax outputs are in [0, 1].
    assert jnp.allclose(out, ref, rtol=2e-2, atol=2e-2), "mismatch vs reference"

    print("KERNEL_OK")
</pallas_src>

<mosaic_0001>
module attributes {stable_mosaic.version = 11 : i64} {
  func.func @_mapmaker_kernel(%arg0: i32, %arg1: i32, %arg2: memref<1x32x256xbf16, #tpu.memory_space<vmem>>, %arg3: memref<2x32xbf16, #tpu.memory_space<vmem>>, %arg4: memref<16x32xf32, #tpu.memory_space<vmem>>, %arg5: memref<16x16xf32, #tpu.memory_space<vmem>>, %arg6: memref<1x2x16x32xf32, #tpu.memory_space<vmem>>, %arg7: memref<2x16x16xf32, #tpu.memory_space<vmem>>, %arg8: memref<2x16x32xf32, #tpu.memory_space<vmem>>) attributes {dimension_semantics = [#tpu.dimension_semantics<parallel>, #tpu.dimension_semantics<arbitrary>], iteration_bounds = array<i64: 2, 2>, scalar_prefetch = 0 : i64, scratch_operands = 2 : i64, tpu.core_type = #tpu.core_type<tc>, window_params = [{transform_indices = @transform_0, window_bounds = array<i64: 1, 32, 256>}, {pipeline_mode = #tpu.pipeline_mode<synchronous>, transform_indices = @transform_1, window_bounds = array<i64: 2, 32>}, {pipeline_mode = #tpu.pipeline_mode<synchronous>, transform_indices = @transform_2, window_bounds = array<i64: 16, 32>}, {transform_indices = @transform_3, window_bounds = array<i64: 16, 16>}, {transform_indices = @transform_4, window_bounds = array<i64: 1, 2, 16, 32>}]} {
    %c0_i32 = arith.constant 0 : i32
    %0 = arith.cmpi eq, %arg1, %c0_i32 : i32
    %1 = arith.extui %0 : i1 to i32
    %c0_i32_0 = arith.constant 0 : i32
    %2 = arith.cmpi ne, %1, %c0_i32_0 : i32
    scf.if %2 {
      %c0_19 = arith.constant 0 : index
      %c0_20 = arith.constant 0 : index
      %24 = vector.load %arg3[%c0_19, %c0_20] : memref<2x32xbf16, #tpu.memory_space<vmem>>, vector<2x32xbf16>
      %c0_21 = arith.constant 0 : index
      %c0_22 = arith.constant 0 : index
      %c0_23 = arith.constant 0 : index
      %25 = vector.load %arg2[%c0_21, %c0_22, %c0_23] : memref<1x32x256xbf16, #tpu.memory_space<vmem>>, vector<1x32x256xbf16>
      %26 = vector.shape_cast %25 : vector<1x32x256xbf16> to vector<32x256xbf16>
      %cst_24 = arith.constant dense<0.000000e+00> : vector<2x256xf32>
      %27 = tpu.matmul %24, %26, %cst_24 {dimension_numbers = #tpu.dot_dimension_numbers<[1], [0], [0], [1], [0, 0, 1, 1], [], []>} : vector<2x32xbf16>, vector<32x256xbf16>, vector<2x256xf32> -> vector<2x256xf32>
      %28 = vector.extract_strided_slice %27 {offsets = [0, 0], sizes = [2, 16], strides = [1, 1]} : vector<2x256xf32> to vector<2x16xf32>
      %c0_25 = arith.constant 0 : index
      %c0_26 = arith.constant 0 : index
      %c0_27 = arith.constant 0 : index
      %29 = vector.load %arg7[%c0_25, %c0_26, %c0_27] : memref<2x16x16xf32, #tpu.memory_space<vmem>>, vector<2x1x16xf32>
      %30 = vector.shape_cast %29 : vector<2x1x16xf32> to vector<2x16xf32>
      %31 = vector.shape_cast %28 : vector<2x16xf32> to vector<2x1x16xf32>
      tpu.vector_store %arg7[%c0_25, %c0_26, %c0_27], %31 {strides = array<i32>} : memref<2x16x16xf32, #tpu.memory_space<vmem>>, vector<2x1x16xf32>,
      %32 = vector.extract_strided_slice %27 {offsets = [0, 16], sizes = [2, 16], strides = [1, 1]} : vector<2x256xf32> to vector<2x16xf32>
      %c0_28 = arith.constant 0 : index
      %c1_29 = arith.constant 1 : index
      %c0_30 = arith.constant 0 : index
      %33 = vector.load %arg7[%c0_28, %c1_29, %c0_30] : memref<2x16x16xf32, #tpu.memory_space<vmem>>, vector<2x1x16xf32>
      %34 = vector.shape_cast %33 : vector<2x1x16xf32> to vector<2x16xf32>
      %35 = vector.shape_cast %32 : vector<2x16xf32> to vector<2x1x16xf32>
      tpu.vector_store %arg7[%c0_28, %c1_29, %c0_30], %35 {strides = array<i32>} : memref<2x16x16xf32, #tpu.memory_space<vmem>>, vector<2x1x16xf32>,
      %36 = vector.extract_strided_slice %27 {offsets = [0, 32], sizes = [2, 16], strides = [1, 1]} : vector<2x256xf32> to vector<2x16xf32>
      %c0_31 = arith.constant 0 : index
      %c2 = arith.constant 2 : index
      %c0_32 = arith.constant 0 : index
      %37 = vector.load %arg7[%c0_31, %c2, %c0_32] : memref<2x16x16xf32, #tpu.memory_space<vmem>>, vector<2x1x16xf32>
      %38 = vector.shape_cast %37 : vector<2x1x16xf32> to vector<2x16xf32>
      %39 = vector.shape_cast %36 : vector<2x16xf32> to vector<2x1x16xf32>
      tpu.vector_store %arg7[%c0_31, %c2, %c0_32], %39 {strides = array<i32>} : memref<2x16x16xf32, #tpu.memory_space<vmem>>, vector<2x1x16xf32>,
      %40 = vector.extract_strided_slice %27 {offsets = [0, 48], sizes = [2, 16], strides = [1, 1]} : vector<2x256xf32> to vector<2x16xf32>
      %c0_33 = arith.constant 0 : index
      %c3 = arith.constant 3 : index
      %c0_34 = arith.constant 0 : index
      %41 = vector.load %arg7[%c0_33, %c3, %c0_34] : memref<2x16x16xf32, #tpu.memory_space<vmem>>, vector<2x1x16xf32>
      %42 = vector.shape_cast %41 : vector<2x1x16xf32> to vector<2x16xf32>
      %43 = vector.shape_cast %40 : vector<2x16xf32> to vector<2x1x16xf32>
      tpu.vector_store %arg7[%c0_33, %c3, %c0_34], %43 {strides = array<i32>} : memref<2x16x16xf32, #tpu.memory_space<vmem>>, vector<2x1x16xf32>,
      %44 = vector.extract_strided_slice %27 {offsets = [0, 64], sizes = [2, 16], strides = [1, 1]} : vector<2x256xf32> to vector<2x16xf32>
      %c0_35 = arith.constant 0 : index
      %c4 = arith.constant 4 : index
      %c0_36 = arith.constant 0 : index
      %45 = vector.load %arg7[%c0_35, %c4, %c0_36] : memref<2x16x16xf32, #tpu.memory_space<vmem>>, vector<2x1x16xf32>
      %46 = vector.shape_cast %45 : vector<2x1x16xf32> to vector<2x16xf32>
      %47 = vector.shape_cast %44 : vector<2x16xf32> to vector<2x1x16xf32>
      tpu.vector_store %arg7[%c0_35, %c4, %c0_36], %47 {strides = array<i32>} : memref<2x16x16xf32, #tpu.memory_space<vmem>>, vector<2x1x16xf32>,
      %48 = vector.extract_strided_slice %27 {offsets = [0, 80], sizes = [2, 16], strides = [1, 1]} : vector<2x256xf32> to vector<2x16xf32>
      %c0_37 = arith.constant 0 : index
      %c5 = arith.constant 5 : index
      %c0_38 = arith.constant 0 : index
      %49 = vector.load %arg7[%c0_37, %c5, %c0_38] : memref<2x16x16xf32, #tpu.memory_space<vmem>>, vector<2x1x16xf32>
      %50 = vector.shape_cast %49 : vector<2x1x16xf32> to vector<2x16xf32>
      %51 = vector.shape_cast %48 : vector<2x16xf32> to vector<2x1x16xf32>
      tpu.vector_store %arg7[%c0_37, %c5, %c0_38], %51 {strides = array<i32>} : memref<2x16x16xf32, #tpu.memory_space<vmem>>, vector<2x1x16xf32>,
      %52 = vector.extract_strided_slice %27 {offsets = [0, 96], sizes = [2, 16], strides = [1, 1]} : vector<2x256xf32> to vector<2x16xf32>
      %c0_39 = arith.constant 0 : index
      %c6 = arith.constant 6 : index
      %c0_40 = arith.constant 0 : index
      %53 = vector.load %arg7[%c0_39, %c6, %c0_40] : memref<2x16x16xf32, #tpu.memory_space<vmem>>, vector<2x1x16xf32>
      %54 = vector.shape_cast %53 : vector<2x1x16xf32> to vector<2x16xf32>
      %55 = vector.shape_cast %52 : vector<2x16xf32> to vector<2x1x16xf32>
      tpu.vector_store %arg7[%c0_39, %c6, %c0_40], %55 {strides = array<i32>} : memref<2x16x16xf32, #tpu.memory_space<vmem>>, vector<2x1x16xf32>,
      %56 = vector.extract_strided_slice %27 {offsets = [0, 112], sizes = [2, 16], strides = [1, 1]} : vector<2x256xf32> to vector<2x16xf32>
      %c0_41 = arith.constant 0 : index
      %c7 = arith.constant 7 : index
      %c0_42 = arith.constant 0 : index
      %57 = vector.load %arg7[%c0_41, %c7, %c0_42] : memref<2x16x16xf32, #tpu.memory_space<vmem>>, vector<2x1x16xf32>
      %58 = vector.shape_cast %57 : vector<2x1x16xf32> to vector<2x16xf32>
      %59 = vector.shape_cast %56 : vector<2x16xf32> to vector<2x1x16xf32>
      tpu.vector_store %arg7[%c0_41, %c7, %c0_42], %59 {strides = array<i32>} : memref<2x16x16xf32, #tpu.memory_space<vmem>>, vector<2x1x16xf32>,
      %60 = vector.extract_strided_slice %27 {offsets = [0, 128], sizes = [2, 16], strides = [1, 1]} : vector<2x256xf32> to vector<2x16xf32>
      %c0_43 = arith.constant 0 : index
      %c8 = arith.constant 8 : index
      %c0_44 = arith.constant 0 : index
      %61 = vector.load %arg7[%c0_43, %c8, %c0_44] : memref<2x16x16xf32, #tpu.memory_space<vmem>>, vector<2x1x16xf32>
      %62 = vector.shape_cast %61 : vector<2x1x16xf32> to vector<2x16xf32>
      %63 = vector.shape_cast %60 : vector<2x16xf32> to vector<2x1x16xf32>
      tpu.vector_store %arg7[%c0_43, %c8, %c0_44], %63 {strides = array<i32>} : memref<2x16x16xf32, #tpu.memory_space<vmem>>, vector<2x1x16xf32>,
      %64 = vector.extract_strided_slice %27 {offsets = [0, 144], sizes = [2, 16], strides = [1, 1]} : vector<2x256xf32> to vector<2x16xf32>
      %c0_45 = arith.constant 0 : index
      %c9 = arith.constant 9 : index
      %c0_46 = arith.constant 0 : index
      %65 = vector.load %arg7[%c0_45, %c9, %c0_46] : memref<2x16x16xf32, #tpu.memory_space<vmem>>, vector<2x1x16xf32>
      %66 = vector.shape_cast %65 : vector<2x1x16xf32> to vector<2x16xf32>
      %67 = vector.shape_cast %64 : vector<2x16xf32> to vector<2x1x16xf32>
      tpu.vector_store %arg7[%c0_45, %c9, %c0_46], %67 {strides = array<i32>} : memref<2x16x16xf32, #tpu.memory_space<vmem>>, vector<2x1x16xf32>,
      %68 = vector.extract_strided_slice %27 {offsets = [0, 160], sizes = [2, 16], strides = [1, 1]} : vector<2x256xf32> to vector<2x16xf32>
      %c0_47 = arith.constant 0 : index
      %c10 = arith.constant 10 : index
      %c0_48 = arith.constant 0 : index
      %69 = vector.load %arg7[%c0_47, %c10, %c0_48] : memref<2x16x16xf32, #tpu.memory_space<vmem>>, vector<2x1x16xf32>
      %70 = vector.shape_cast %69 : vector<2x1x16xf32> to vector<2x16xf32>
      %71 = vector.shape_cast %68 : vector<2x16xf32> to vector<2x1x16xf32>
      tpu.vector_store %arg7[%c0_47, %c10, %c0_48], %71 {strides = array<i32>} : memref<2x16x16xf32, #tpu.memory_space<vmem>>, vector<2x1x16xf32>,
      %72 = vector.extract_strided_slice %27 {offsets = [0, 176], sizes = [2, 16], strides = [1, 1]} : vector<2x256xf32> to vector<2x16xf32>
      %c0_49 = arith.constant 0 : index
      %c11 = arith.constant 11 : index
      %c0_50 = arith.constant 0 : index
      %73 = vector.load %arg7[%c0_49, %c11, %c0_50] : memref<2x16x16xf32, #tpu.memory_space<vmem>>, vector<2x1x16xf32>
      %74 = vector.shape_cast %73 : vector<2x1x16xf32> to vector<2x16xf32>
      %75 = vector.shape_cast %72 : vector<2x16xf32> to vector<2x1x16xf32>
      tpu.vector_store %arg7[%c0_49, %c11, %c0_50], %75 {strides = array<i32>} : memref<2x16x16xf32, #tpu.memory_space<vmem>>, vector<2x1x16xf32>,
      %76 = vector.extract_strided_slice %27 {offsets = [0, 192], sizes = [2, 16], strides = [1, 1]} : vector<2x256xf32> to vector<2x16xf32>
      %c0_51 = arith.constant 0 : index
      %c12 = arith.constant 12 : index
      %c0_52 = arith.constant 0 : index
      %77 = vector.load %arg7[%c0_51, %c12, %c0_52] : memref<2x16x16xf32, #tpu.memory_space<vmem>>, vector<2x1x16xf32>
      %78 = vector.shape_cast %77 : vector<2x1x16xf32> to vector<2x16xf32>
      %79 = vector.shape_cast %76 : vector<2x16xf32> to vector<2x1x16xf32>
      tpu.vector_store %arg7[%c0_51, %c12, %c0_52], %79 {strides = array<i32>} : memref<2x16x16xf32, #tpu.memory_space<vmem>>, vector<2x1x16xf32>,
      %80 = vector.extract_strided_slice %27 {offsets = [0, 208], sizes = [2, 16], strides = [1, 1]} : vector<2x256xf32> to vector<2x16xf32>
      %c0_53 = arith.constant 0 : index
      %c13 = arith.constant 13 : index
      %c0_54 = arith.constant 0 : index
      %81 = vector.load %arg7[%c0_53, %c13, %c0_54] : memref<2x16x16xf32, #tpu.memory_space<vmem>>, vector<2x1x16xf32>
      %82 = vector.shape_cast %81 : vector<2x1x16xf32> to vector<2x16xf32>
      %83 = vector.shape_cast %80 : vector<2x16xf32> to vector<2x1x16xf32>
      tpu.vector_store %arg7[%c0_53, %c13, %c0_54], %83 {strides = array<i32>} : memref<2x16x16xf32, #tpu.memory_space<vmem>>, vector<2x1x16xf32>,
      %84 = vector.extract_strided_slice %27 {offsets = [0, 224], sizes = [2, 16], strides = [1, 1]} : vector<2x256xf32> to vector<2x16xf32>
      %c0_55 = arith.constant 0 : index
      %c14 = arith.constant 14 : index
      %c0_56 = arith.constant 0 : index
      %85 = vector.load %arg7[%c0_55, %c14, %c0_56] : memref<2x16x16xf32, #tpu.memory_space<vmem>>, vector<2x1x16xf32>
      %86 = vector.shape_cast %85 : vector<2x1x16xf32> to vector<2x16xf32>
      %87 = vector.shape_cast %84 : vector<2x16xf32> to vector<2x1x16xf32>
      tpu.vector_store %arg7[%c0_55, %c14, %c0_56], %87 {strides = array<i32>} : memref<2x16x16xf32, #tpu.memory_space<vmem>>, vector<2x1x16xf32>,
      %88 = vector.extract_strided_slice %27 {offsets = [0, 240], sizes = [2, 16], strides = [1, 1]} : vector<2x256xf32> to vector<2x16xf32>
      %c0_57 = arith.constant 0 : index
      %c15 = arith.constant 15 : index
      %c0_58 = arith.constant 0 : index
      %89 = vector.load %arg7[%c0_57, %c15, %c0_58] : memref<2x16x16xf32, #tpu.memory_space<vmem>>, vector<2x1x16xf32>
      %90 = vector.shape_cast %89 : vector<2x1x16xf32> to vector<2x16xf32>
      %91 = vector.shape_cast %88 : vector<2x16xf32> to vector<2x1x16xf32>
      tpu.vector_store %arg7[%c0_57, %c15, %c0_58], %91 {strides = array<i32>} : memref<2x16x16xf32, #tpu.memory_space<vmem>>, vector<2x1x16xf32>,
      %c0_59 = arith.constant 0 : index
      %c0_60 = arith.constant 0 : index
      %92 = vector.load %arg4[%c0_59, %c0_60] : memref<16x32xf32, #tpu.memory_space<vmem>>, vector<16x32xf32>
      %c0_61 = arith.constant 0 : index
      %c0_62 = arith.constant 0 : index
      %c0_63 = arith.constant 0 : index
      %93 = vector.load %arg7[%c0_61, %c0_62, %c0_63] : memref<2x16x16xf32, #tpu.memory_space<vmem>>, vector<1x16x16xf32>
      %94 = vector.shape_cast %93 : vector<1x16x16xf32> to vector<16x16xf32>
      %cst_64 = arith.constant dense<0.000000e+00> : vector<16x32xf32>
      %95 = tpu.matmul %94, %92, %cst_64 {dimension_numbers = #tpu.dot_dimension_numbers<[1], [0], [0], [1], [0, 0, 1, 1], [], []>} : vector<16x16xf32>, vector<16x32xf32>, vector<16x32xf32> -> vector<16x32xf32>
      %c0_65 = arith.constant 0 : index
      %c0_66 = arith.constant 0 : index
      %c0_67 = arith.constant 0 : index
      %96 = vector.load %arg8[%c0_65, %c0_66, %c0_67] : memref<2x16x32xf32, #tpu.memory_space<vmem>>, vector<1x16x32xf32>
      %97 = vector.shape_cast %96 : vector<1x16x32xf32> to vector<16x32xf32>
      %98 = vector.shape_cast %95 : vector<16x32xf32> to vector<1x16x32xf32>
      tpu.vector_store %arg8[%c0_65, %c0_66, %c0_67], %98 {strides = array<i32>} : memref<2x16x32xf32, #tpu.memory_space<vmem>>, vector<1x16x32xf32>,
      %c1_68 = arith.constant 1 : index
      %c0_69 = arith.constant 0 : index
      %c0_70 = arith.constant 0 : index
      %99 = vector.load %arg7[%c1_68, %c0_69, %c0_70] : memref<2x16x16xf32, #tpu.memory_space<vmem>>, vector<1x16x16xf32>
      %100 = vector.shape_cast %99 : vector<1x16x16xf32> to vector<16x16xf32>
      %cst_71 = arith.constant dense<0.000000e+00> : vector<16x32xf32>
      %101 = tpu.matmul %100, %92, %cst_71 {dimension_numbers = #tpu.dot_dimension_numbers<[1], [0], [0], [1], [0, 0, 1, 1], [], []>} : vector<16x16xf32>, vector<16x32xf32>, vector<16x32xf32> -> vector<16x32xf32>
      %c1_72 = arith.constant 1 : index
      %c0_73 = arith.constant 0 : index
      %c0_74 = arith.constant 0 : index
      %102 = vector.load %arg8[%c1_72, %c0_73, %c0_74] : memref<2x16x32xf32, #tpu.memory_space<vmem>>, vector<1x16x32xf32>
      %103 = vector.shape_cast %102 : vector<1x16x32xf32> to vector<16x32xf32>
      %104 = vector.shape_cast %101 : vector<16x32xf32> to vector<1x16x32xf32>
      tpu.vector_store %arg8[%c1_72, %c0_73, %c0_74], %104 {strides = array<i32>} : memref<2x16x32xf32, #tpu.memory_space<vmem>>, vector<1x16x32xf32>,
    } else {
    }
    %c0 = arith.constant 0 : index
    %c0_1 = arith.constant 0 : index
    %3 = vector.load %arg5[%c0, %c0_1] : memref<16x16xf32, #tpu.memory_space<vmem>>, vector<16x16xf32>
    %c0_2 = arith.constant 0 : index
    %c0_3 = arith.constant 0 : index
    %c0_4 = arith.constant 0 : index
    %4 = vector.load %arg8[%c0_2, %c0_3, %c0_4] : memref<2x16x32xf32, #tpu.memory_space<vmem>>, vector<1x16x32xf32>
    %5 = vector.shape_cast %4 : vector<1x16x32xf32> to vector<16x32xf32>
    %cst = arith.constant dense<0.000000e+00> : vector<16x32xf32>
    %6 = tpu.matmul %3, %5, %cst {dimension_numbers = #tpu.dot_dimension_numbers<[1], [0], [0], [1], [0, 0, 1, 1], [], []>} : vector<16x16xf32>, vector<16x32xf32>, vector<16x32xf32> -> vector<16x32xf32>
    %c1 = arith.constant 1 : index
    %c0_5 = arith.constant 0 : index
    %c0_6 = arith.constant 0 : index
    %7 = vector.load %arg8[%c1, %c0_5, %c0_6] : memref<2x16x32xf32, #tpu.memory_space<vmem>>, vector<1x16x32xf32>
    %8 = vector.shape_cast %7 : vector<1x16x32xf32> to vector<16x32xf32>
    %cst_7 = arith.constant dense<0.000000e+00> : vector<16x32xf32>
    %9 = tpu.matmul %3, %8, %cst_7 {dimension_numbers = #tpu.dot_dimension_numbers<[1], [0], [0], [1], [0, 0, 1, 1], [], []>} : vector<16x16xf32>, vector<16x32xf32>, vector<16x32xf32> -> vector<16x32xf32>
    %10 = arith.subf %9, %6 : vector<16x32xf32>
    %11 = math.exp %10 : vector<16x32xf32>
    %cst_8 = arith.constant 1.000000e+00 : f32
    %12 = vector.broadcast %cst_8 : f32 to vector<16x32xf32>
    %13 = arith.addf %12, %11 : vector<16x32xf32>
    %cst_9 = arith.constant 1.000000e+00 : f32
    %14 = vector.broadcast %cst_9 : f32 to vector<16x32xf32>
    %15 = arith.divf %14, %13 : vector<16x32xf32>
    %c0_10 = arith.constant 0 : index
    %c0_11 = arith.constant 0 : index
    %c0_12 = arith.constant 0 : index
    %c0_13 = arith.constant 0 : index
    %16 = vector.load %arg6[%c0_10, %c0_11, %c0_12, %c0_13] : memref<1x2x16x32xf32, #tpu.memory_space<vmem>>, vector<1x1x16x32xf32>
    %17 = vector.shape_cast %16 : vector<1x1x16x32xf32> to vector<16x32xf32>
    %18 = vector.shape_cast %15 : vector<16x32xf32> to vector<1x1x16x32xf32>
    tpu.vector_store %arg6[%c0_10, %c0_11, %c0_12, %c0_13], %18 {strides = array<i32>} : memref<1x2x16x32xf32, #tpu.memory_space<vmem>>, vector<1x1x16x32xf32>,
    %cst_14 = arith.constant 1.000000e+00 : f32
    %19 = vector.broadcast %cst_14 : f32 to vector<16x32xf32>
    %20 = arith.subf %19, %15 : vector<16x32xf32>
    %c0_15 = arith.constant 0 : index
    %c1_16 = arith.constant 1 : index
    %c0_17 = arith.constant 0 : index
    %c0_18 = arith.constant 0 : index
    %21 = vector.load %arg6[%c0_15, %c1_16, %c0_17, %c0_18] : memref<1x2x16x32xf32, #tpu.memory_space<vmem>>, vector<1x1x16x32xf32>
    %22 = vector.shape_cast %21 : vector<1x1x16x32xf32> to vector<16x32xf32>
    %23 = vector.shape_cast %20 : vector<16x32xf32> to vector<1x1x16x32xf32>
    tpu.vector_store %arg6[%c0_15, %c1_16, %c0_17, %c0_18], %23 {strides = array<i32>} : memref<1x2x16x32xf32, #tpu.memory_space<vmem>>, vector<1x1x16x32xf32>,
    return
  }
  func.func @transform_0(%arg0: i32, %arg1: i32) -> (i32, i32, i32) {
    %c0_i32 = arith.constant 0 : i32
    %c0_i32_0 = arith.constant 0 : i32
    %c0_i32_1 = arith.constant 0 : i32
    return %arg0, %c0_i32, %c0_i32_0 : i32, i32, i32
  }
  func.func @transform_1(%arg0: i32, %arg1: i32) -> (i32, i32) {
    %c0_i32 = arith.constant 0 : i32
    %c0_i32_0 = arith.constant 0 : i32
    %c0_i32_1 = arith.constant 0 : i32
    return %c0_i32, %c0_i32_0 : i32, i32
  }
  func.func @transform_2(%arg0: i32, %arg1: i32) -> (i32, i32) {
    %c0_i32 = arith.constant 0 : i32
    %c0_i32_0 = arith.constant 0 : i32
    %c0_i32_1 = arith.constant 0 : i32
    return %c0_i32, %c0_i32_0 : i32, i32
  }
  func.func @transform_3(%arg0: i32, %arg1: i32) -> (i32, i32) {
    %c0_i32 = arith.constant 0 : i32
    %c0_i32_0 = arith.constant 0 : i32
    return %arg1, %c0_i32 : i32, i32
  }
  func.func @transform_4(%arg0: i32, %arg1: i32) -> (i32, i32, i32, i32) {
    %c0_i32 = arith.constant 0 : i32
    %c0_i32_0 = arith.constant 0 : i32
    %c0_i32_1 = arith.constant 0 : i32
    return %arg0, %c0_i32, %arg1, %c0_i32_0 : i32, i32, i32, i32
  }
}

</mosaic_0001>

<bundles_post_ra>
// kernel: mapmaker_forward.1
= control target key start
LH: loop header
LB: loop body
LE: loop exit
PB: predicated region body
PF: predicated region fallthrough
CT: control target
= control target key end

     0   :  { %9 = vsyncpa [#allocation5], 0  ;;  %s1524_s0 = inlined_call_operand.vmem [shape: bf16[2,32,256], index: 0, kind: input, shape index: {}]   ;;  %s1525_s1 = inlined_call_operand.vmem [shape: bf16[2,32], index: 1, kind: input, shape index: {}]   ;;  %s1526_s2 = inlined_call_operand.vmem [shape: f32[16,32], index: 2, kind: input, shape index: {}]   ;;  %s1527_s3 = inlined_call_operand.vmem [shape: f32[32,16], index: 3, kind: input, shape index: {}]   ;;  %s1528_s4 = inlined_call_operand.hbm [shape: f32[2,2,32,32], index: 4, kind: output, shape index: {}]  }
   0x1   :  { %11 = vsyncpa [#allocation5 + $0x1], 0  ;;  %s1292_s15 = smov 0   ;;  %s1294_s16 = smov 0  }
   0x2   :  { %s1296_s17 = smov 0   ;;  %s1298_s18 = smov 0  }
   0x3   :  { %s1300_s19 = smov 0   ;;  %s1302_s20 = smov 0  }
   0x4   :  { %s1304_s21 = smov 0   ;;  %s1306_s22 = smov 0  }
   0x5 LB: > { %s983_s23 = sadd.s32 4294967295, %s1249_s22   ;;  %s984_s24 = sadd.s32 4294967294, %s1249_s22   ;;  %s1249_s22 = sphi %s1306_s22, %s17_s22   ;;  %s1245_s21 = sphi %s1304_s21, %s1540_s21   ;;  %s1241_s20 = sphi %s1302_s20, %s1539_s20   ;;  %s1237_s19 = sphi %s1300_s19, %s1538_s19   ;;  %s1233_s18 = sphi %s1298_s18, %s1537_s18   ;;  %s1229_s17 = sphi %s1296_s17, %s1536_s17   ;;  %s1225_s16 = sphi %s1294_s16, %s1535_s16   ;;  %s1221_s15 = sphi %s1292_s15, %s1534_s15  }
   0x6   : > { %s26_s25 = sadd.s32 1, %s1241_s20  ;;  %s29_s26 = sadd.s32 1, %s1245_s21 }
   0x7   : > { %p27_p0 = scmp.ge.s32.totalorder %s26_s25, 2  ;;  %p142_p1 = scmp.ne.s32.totalorder %s1229_s17, %s1225_s16 }
   0x8   : > { %p143_p2 = scmp.eq.s32.totalorder %s983_s23, 3  ;;  %p148_p5 = scmp.ne.s32.totalorder %s1225_s16, %s1221_s15 }
   0x9   : > { %s1542_s25 = smov (%p27_p0, %s26_s25), 0  ;;  %s1544_s26 = smov (!%p27_p0, %s29_s26), %s1245_s21 }
   0xa   : > { %s128_s27 = ssub.s32 %s1241_s20, %s1542_s25  ;;  %p1343_p3 = por %p143_p2, %p142_p1 }
   0xb   : > { %p31_p4 = scmp.ge.s32.totalorder %s1544_s26, 2  ;;  %p149_p6 = scmp.eq.s32.totalorder %s984_s24, 3 }
   0xc   : > { %p987_p7 = scmp.ge.s32.totalorder %s1249_s22, 1  ;;  %p190_p9 = scmp.lt.s32.totalorder %s1249_s22, 5 }
   0xd   : > { %s1546_s26 = smov (%p31_p4, %s1544_s26), 0  ;;  %p1352_p8 = por %p149_p6, %p148_p5 }
   0xe   : > { %1531 = sst [smem:[#allocation9_spill]] %s1546_s26  ;;  %s127_s30 = ssub.s32 %s1245_s21, %s1546_s26 }
   0xf   : > { %s132_s5 = sadd.s32 1, %s1229_s17  ;;  %s129_s6 = sor.u32 %s128_s27, %s127_s30 }
  0x10   : > { %p191_p10 = pnand %p987_p7, %p190_p9  ;;  %p130_p11 = scmp.eq.s32.totalorder %s129_s6, 0 }
  0x11   : > { %s218_s8 = sand.u32 (!%p191_p10), 1, %s1225_s16   ;;  %p221_p12 = scmp.lt.s32.totalorder (!%p191_p10), %s1237_s19, 1 }
  0x12   : > { %s1361_s7 = scalar_select %p130_p11, %s1229_s17, %s132_s5  }
  0x13   : > { %194 = sbr.rel (%p191_p10) target bundleno = 913 (0x391), region = 36  ;;  %s988_s9 = sshll.u32 (!%p191_p10), %s218_s8, 5 }
  0x14   : > { %s1368_s10 = sshll.u32 (!%p191_p10), %s1233_s18, 1  ;;  %s1381_s26 = scalar_lea.vmem (!%p191_p10), [#allocation4], %s988_s9 }
  0x15   : > { %p227_p13 = scmp.lt.s32.totalorder (!%p191_p10), %s1368_s10, 3  ;;  %p993_p0 = scmp.ne.s32.totalorder (!%p191_p10), %s1233_s18, 0 }
  0x1a   : > { %s222_s11 = scalar_select %p221_p12, %s1237_s19, 1 }
  0x1b   : > { %s228_s12 = scalar_select %p227_p13, %s1368_s10, 3 }
  0x1c   : > { %s1015_s13 = sshll.u32 %s222_s11, 5  ;;  %237 = sbr.rel (%p993_p0) target bundleno = 646 (0x286), region = 40  ;;  %v1251_v2 = vmov (!%p993_p0), 0   ;;  %v238_v5 = vld [vmem:[%s1525_s1] sm:$0x1] (!%p993_p0)  ;;  %vm263_vm0 = vcmask (!%p993_p0), 261120   ;;  %v312_v8 = vlaneseq (!%p993_p0) }
  0x1d   : > { %s225_s24 = scalar_lea.vmem %s1524_s0, %s1015_s13  ;;  %s992_s27 = sshll.u32 %s228_s12, 3  ;;  %299 = vmatprep.mubr.bf16.mxu0 (!%p993_p0), %v1251_v2  ;;  %v1252_v6 = vmov (!%p993_p0), 1966171168   ;;  %vm333_vm1 = vcmask (!%p993_p0), 122880   ;;  %v491_v27 = vld [vmem:[%s1526_s2] sm:$0xff] (!%p993_p0)  ;;  %v492_v28 = vld [vmem:[%s1526_s2 + $0x8] sm:$0xff] (!%p993_p0) }
  0x1e   : > { %s1379_s6 = scalar_lea.vmem %s1527_s3, %s992_s27  ;;  %v1169_v0 = vld [vmem:[%s225_s24 + $0x4] ss:$8 sps:$4 sm:$0xff] (!%p993_p0)   ;;  %v1171_v1 = vld [vmem:[%s225_s24] ss:$8 sps:$4 sm:$0xff] (!%p993_p0)   ;;  %v1172_v3 = vld [vmem:[%s225_s24 + $0x14] ss:$8 sps:$4 sm:$0xff] (!%p993_p0)   ;;  %v310_v7 = vunpack.c.l.s4 (!%p993_p0), %v1252_v6  ;;  %v1406_v29 = vpack.c.bf16 (!%p993_p0), %v492_v28, %v491_v27 }
  0x1f   : > { %267 = vmatprep.subr.bf16.mxu0 (!%p993_p0), %v1169_v0  ;;  %v1174_v4 = vld [vmem:[%s225_s24 + $0x10] ss:$8 sps:$4 sm:$0xff] (!%p993_p0)   ;;  %v313_v10 = vshrl.u32 (!%p993_p0), %v312_v8, 7  ;;  %s1253_s18 = smov (!%p993_p0), 80   ;;  %s1254_s9 = smov (!%p993_p0), 112   ;;  %vm495_vm2 = vcmask (!%p993_p0), 130048  }
  0x20   : > { %268 = vmatpush1.bf16.msra.mxu0 (!%p993_p0), %v1171_v1  ;;  %v311_v9 = vunpack.c.0.s8 (!%p993_p0), %v310_v7  ;;  %s1255_s13 = smov (!%p993_p0), 64   ;;  %s1256_s14 = smov (!%p993_p0), 96   ;;  %1061 = vmatprep.subr.bf16.mxu1 (!%p993_p0), %v1406_v29 }
  0x21   : > { %269 = vmatprep.subr.bf16.mxu0 (!%p993_p0), %v1172_v3  ;;  %v338_v14 = vsub.s32 (!%p993_p0), 0, %v313_v10  ;;  %s1257_s23 = smov (!%p993_p0), 32   ;;  %s1258_s24 = smov (!%p993_p0), 48   ;;  %1063 = vmatpush3.bf16.msra.mxu1 (!%p993_p0), %v1406_v29 }
  0x22   : > { %v314_v11 = vsub.s32 (!%p993_p0), %v311_v9, %v313_v10  ;;  %s1259_s27 = smov (!%p993_p0), 16   ;;  %1065 = vmatprep.subr.bf16.mxu1 (!%p993_p0), %v1406_v29 }
  0x24   : > { %270 = vmatpush1.bf16.msra.mxu0 %v1174_v4 }
  0x27   : > { %998 = vmatmul.mubr.msk.bf16.vlgmr.msra.gmra.mrb[0].mxu0 %vm263_vm0, %v238_v5 }
  0xfa   : > { %v301_v12 = vpop.f32.mrb[0].mxu0 }
  0xfb   : > { %v315_v13 = vrot.slane %v301_v12, %v314_v11  ;;  %v303_v15 = vpop.f32.mrb[1].mxu0 }
  0xfc   : > { %v407_v16 = vrot.slane %v303_v15, %v314_v11  ;;  %v305_v17 = vpop.f32.mrb[2].mxu0 }
  0xfd   : > { %v316_v18 = vcombine.high %v315_v13, %v315_v13  ;;  %v323_v19 = vrot.slane %v315_v13, %v314_v11  ;;  %v306_v20 = vpop.f32.mrb[3].mxu0 }
  0xfe   : > { %v408_v21 = vcombine.high %v407_v16, %v407_v16  ;;  %v415_v22 = vrot.slane %v407_v16, %v314_v11 }
  0xff   : > { %v330_v23 = vrot.slane %v316_v18, %v314_v11  ;;  %334 = vst.msk [vmem:[#allocation2] sm:$0x1] %vm333_vm1, %v323_v19  ;;  %v339_v24 = vrot.slane %v323_v19, %v338_v14 }
 0x100   : > { %v422_v25 = vrot.slane %v408_v21, %v314_v11  ;;  %425 = vst.msk [vmem:[#allocation2 + $0x8] sm:$0x1] %vm333_vm1, %v415_v22  ;;  %v430_v26 = vrot.slane %v415_v22, %v338_v14 }
 0x101   : > { %335 = vst.msk [vmem:[#allocation2 + $0x10] sm:$0x1] %vm333_vm1, %v330_v23  ;;  %360 = vrot.lane.b32.xlu1 %v339_v24, %s1253_s18  ;;  %344 = vrot.lane.b32.xlu0 %v339_v24, %s1254_s9  ;;  %v343_v30 = vrot.slane %v330_v23, %v338_v14 }
 0x102   : > { %426 = vst.msk [vmem:[#allocation2 + $0x18] sm:$0x1] %vm333_vm1, %v422_v25  ;;  %v434_v31 = vrot.slane %v422_v25, %v338_v14 }
 0x105   : > { %368 = vrot.lane.b32.xlu1 %v339_v24, %s1255_s13  ;;  %352 = vrot.lane.b32.xlu0 %v339_v24, %s1256_s14 }
 0x109   : > { %384 = vrot.lane.b32.xlu1 %v339_v24, %s1257_s23  ;;  %376 = vrot.lane.b32.xlu0 %v339_v24, %s1258_s24 }
 0x10d   : > { %392 = vrot.lane.b32.xlu0 %v339_v24, %s1259_s27  ;;  %435 = vrot.lane.b32.xlu1 %v430_v26, %s1254_s9 }
 0x111   : > { %443 = vrot.lane.b32.xlu0 %v430_v26, %s1256_s14  ;;  %451 = vrot.lane.b32.xlu1 %v430_v26, %s1253_s18 }
 0x115   : > { %459 = vrot.lane.b32.xlu0 %v430_v26, %s1255_s13  ;;  %467 = vrot.lane.b32.xlu1 %v430_v26, %s1258_s24 }
 0x119   : > { %475 = vrot.lane.b32.xlu0 %v430_v26, %s1257_s23  ;;  %483 = vrot.lane.b32.xlu1 %v430_v26, %s1259_s27 }
 0x11d   : > { %346 = vrot.lane.b32.xlu0 %v343_v30, %s1254_s9  ;;  %354 = vrot.lane.b32.xlu1 %v343_v30, %s1256_s14 }
 0x121   : > { %362 = vrot.lane.b32.xlu0 %v343_v30, %s1253_s18  ;;  %370 = vrot.lane.b32.xlu1 %v343_v30, %s1255_s13 }
 0x125   : > { %378 = vrot.lane.b32.xlu0 %v343_v30, %s1258_s24  ;;  %386 = vrot.lane.b32.xlu1 %v343_v30, %s1257_s23 }
 0x129   : > { %394 = vrot.lane.b32.xlu0 %v343_v30, %s1259_s27  ;;  %437 = vrot.lane.b32.xlu1 %v434_v31, %s1254_s9 }
 0x12d   : > { %445 = vrot.lane.b32.xlu0 %v434_v31, %s1256_s14  ;;  %453 = vrot.lane.b32.xlu1 %v434_v31, %s1253_s18 }
 0x131   : > { %461 = vrot.lane.b32.xlu0 %v434_v31, %s1255_s13  ;;  %469 = vrot.lane.b32.xlu1 %v434_v31, %s1258_s24 }
 0x135   : > { %477 = vrot.lane.b32.xlu0 %v434_v31, %s1257_s23  ;;  %485 = vrot.lane.b32.xlu1 %v434_v31, %s1259_s27 }
 0x173   : > { %v361_v32 = vpop.permute.xlu1 %360  ;;  %v345_v33 = vpop.permute.xlu0 %344 }
 0x174   : > { %366 = vst.msk [vmem:[#allocation2 + $0x3] sm:$0x1] %vm333_vm1, %v361_v32  ;;  %350 = vst.msk [vmem:[#allocation2 + $0x1] sm:$0x1] %vm333_vm1, %v345_v33 }
 0x177   : > { %v369_v34 = vpop.permute.xlu1 %368  ;;  %v353_v35 = vpop.permute.xlu0 %352 }
 0x178   : > { %374 = vst.msk [vmem:[#allocation2 + $0x4] sm:$0x1] %vm333_vm1, %v369_v34  ;;  %358 = vst.msk [vmem:[#allocation2 + $0x2] sm:$0x1] %vm333_vm1, %v353_v35 }
 0x17b   : > { %v385_v36 = vpop.permute.xlu1 %384  ;;  %v377_v37 = vpop.permute.xlu0 %376 }
 0x17c   : > { %390 = vst.msk [vmem:[#allocation2 + $0x6] sm:$0x1] %vm333_vm1, %v385_v36  ;;  %382 = vst.msk [vmem:[#allocation2 + $0x5] sm:$0x1] %vm333_vm1, %v377_v37 }
 0x17f   : > { %v393_v38 = vpop.permute.xlu0 %392  ;;  %v436_v39 = vpop.permute.xlu1 %435 }
 0x180   : > { %398 = vst.msk [vmem:[#allocation2 + $0x7] sm:$0x1] %vm333_vm1, %v393_v38  ;;  %441 = vst.msk [vmem:[#allocation2 + $0x9] sm:$0x1] %vm333_vm1, %v436_v39 }
 0x183   : > { %v444_v40 = vpop.permute.xlu0 %443  ;;  %v452_v41 = vpop.permute.xlu1 %451 }
 0x184   : > { %449 = vst.msk [vmem:[#allocation2 + $0xa] sm:$0x1] %vm333_vm1, %v444_v40  ;;  %457 = vst.msk [vmem:[#allocation2 + $0xb] sm:$0x1] %vm333_vm1, %v452_v41 }
 0x187   : > { %v460_v42 = vpop.permute.xlu0 %459  ;;  %v468_v43 = vpop.permute.xlu1 %467  ;;  %v493_v44 = vld [vmem:[#allocation2] sm:$0xff] }
 0x188   : > { %465 = vst.msk [vmem:[#allocation2 + $0xc] sm:$0x1] %vm333_vm1, %v460_v42  ;;  %473 = vst.msk [vmem:[#allocation2 + $0xd] sm:$0x1] %vm333_vm1, %v468_v43  ;;  %1036 = vmatprep.mubr.msk.f32.mxu1 %vm495_vm2, %v493_v44 }
 0x18b   : > { %v476_v45 = vpop.permute.xlu0 %475  ;;  %v484_v46 = vpop.permute.xlu1 %483 }
 0x18c   : > { %481 = vst.msk [vmem:[#allocation2 + $0xe] sm:$0x1] %vm333_vm1, %v476_v45  ;;  %489 = vst.msk [vmem:[#allocation2 + $0xf] sm:$0x1] %vm333_vm1, %v484_v46 }
 0x18f   : > { %v347_v47 = vpop.permute.xlu0 %346  ;;  %v355_v48 = vpop.permute.xlu1 %354 }
 0x190   : > { %351 = vst.msk [vmem:[#allocation2 + $0x11] sm:$0x1] %vm333_vm1, %v347_v47  ;;  %359 = vst.msk [vmem:[#allocation2 + $0x12] sm:$0x1] %vm333_vm1, %v355_v48 }
 0x193   : > { %v363_v49 = vpop.permute.xlu0 %362  ;;  %v371_v50 = vpop.permute.xlu1 %370  ;;  %v494_v51 = vld [vmem:[#allocation2 + $0x8] sm:$0xff] }
 0x194   : > { %367 = vst.msk [vmem:[#allocation2 + $0x13] sm:$0x1] %vm333_vm1, %v363_v49  ;;  %375 = vst.msk [vmem:[#allocation2 + $0x14] sm:$0x1] %vm333_vm1, %v371_v50  ;;  %1037 = vmatmul.mubr.msk.f32.vlgmr.msra.gmra.mrb[0].mxu1 %vm495_vm2, %v494_v51 }
 0x195   : > { %1067 = vmatpush3.bf16.msra.mxu1 %v1406_v29 }
 0x197   : > { %v379_v52 = vpop.permute.xlu0 %378  ;;  %v387_v53 = vpop.permute.xlu1 %386 }
 0x198   : > { %383 = vst.msk [vmem:[#allocation2 + $0x15] sm:$0x1] %vm333_vm1, %v379_v52  ;;  %391 = vst.msk [vmem:[#allocation2 + $0x16] sm:$0x1] %vm333_vm1, %v387_v53 }
 0x19b   : > { %v395_v54 = vpop.permute.xlu0 %394  ;;  %v438_v55 = vpop.permute.xlu1 %437 }
 0x19c   : > { %399 = vst.msk [vmem:[#allocation2 + $0x17] sm:$0x1] %vm333_vm1, %v395_v54  ;;  %442 = vst.msk [vmem:[#allocation2 + $0x19] sm:$0x1] %vm333_vm1, %v438_v55 }
 0x19f   : > { %v446_v56 = vpop.permute.xlu0 %445  ;;  %v454_v57 = vpop.permute.xlu1 %453 }
 0x1a0   : > { %450 = vst.msk [vmem:[#allocation2 + $0x1a] sm:$0x1] %vm333_vm1, %v446_v56  ;;  %458 = vst.msk [vmem:[#allocation2 + $0x1b] sm:$0x1] %vm333_vm1, %v454_v57 }
 0x1a3   : > { %v462_v58 = vpop.permute.xlu0 %461  ;;  %v470_v59 = vpop.permute.xlu1 %469  ;;  %v580_v60 = vld [vmem:[#allocation2 + $0x10] sm:$0xff] }
 0x1a4   : > { %466 = vst.msk [vmem:[#allocation2 + $0x1c] sm:$0x1] %vm333_vm1, %v462_v58  ;;  %474 = vst.msk [vmem:[#allocation2 + $0x1d] sm:$0x1] %vm333_vm1, %v470_v59  ;;  %1043 = vmatprep.mubr.msk.f32.mxu1 %vm495_vm2, %v580_v60 }
 0x1a7   : > { %v478_v61 = vpop.permute.xlu0 %477  ;;  %v486_v62 = vpop.permute.xlu1 %485 }
 0x1a8   : > { %482 = vst.msk [vmem:[#allocation2 + $0x1e] sm:$0x1] %vm333_vm1, %v478_v61  ;;  %490 = vst.msk [vmem:[#allocation2 + $0x1f] sm:$0x1] %vm333_vm1, %v486_v62 }
 0x1af   : > { %v581_v63 = vld [vmem:[#allocation2 + $0x18] sm:$0xff] }
 0x1b0   : > { %1044 = vmatmul.mubr.msk.f32.vlgmr.msra.gmra.mrb[2].mxu1 %vm495_vm2, %v581_v63 }
 0x267   : > { %v1038_v0 = vpop.f32.mrb[0].mxu1 }
 0x268   : > { %578 = vst.msk [vmem:[#allocation3 + $0x8] sm:$0xff] %vm263_vm0, %v1038_v0  ;;  %v568_v1 = vpop.f32.mrb[1].mxu1 }
 0x269   : > { %577 = vst.msk [vmem:[#allocation3] sm:$0xff] %vm263_vm0, %v568_v1 }
 0x283   : > { %v1045_v2 = vpop.f32.mrb[2].mxu1 }
 0x284   : > { %665 = vst.msk [vmem:[#allocation3 + $0x18] sm:$0xff] %vm263_vm0, %v1045_v2  ;;  %v654_v3 = vpop.f32.mrb[3].mxu1 }
 0x285   : > { %664 = vst.msk [vmem:[#allocation3 + $0x10] sm:$0xff] %vm263_vm0, %v654_v3 }
 0x286 PF: > { %v668_v4 = vld [vmem:[#allocation3] sm:$0xff]  ;;  %v669_v5 = vld [vmem:[#allocation3 + $0x8] sm:$0xff]  ;;  %vm670_vm3 = vcmask 130048   ;;  %vm842_vm4 = vcmask 261120  }
 0x287   : > { %v1068_v7 = vpack.c.bf16 %v669_v5, %v668_v4  ;;  %v666_v9 = vld [vmem:[%s1379_s6] sm:$0xff]  ;;  %v667_v11 = vld [vmem:[%s1379_s6 + $0x8] sm:$0xff]  ;;  %s851_s6 = scalar_lea.sflag [#allocation5], %s218_s8 }
 0x288   : > { %1050 = vmatprep.mubr.msk.f32.mxu0 %vm670_vm3, %v666_v9  ;;  %1057 = vmatprep.mubr.msk.f32.mxu1 %vm670_vm3, %v666_v9 }
 0x289   : > { %1069 = vmatprep.subr.bf16.mxu0 %v1068_v7 }
 0x28a   : > { %1071 = vmatpush3.bf16.msra.mxu0 %v1068_v7 }
 0x28b   : > { %v754_v8 = vld [vmem:[#allocation3 + $0x18] sm:$0xff] }
 0x28c   : > { %v753_v6 = vld [vmem:[#allocation3 + $0x10] sm:$0xff] }
 0x28d   : > { %v1072_v10 = vpack.c.bf16 %v754_v8, %v753_v6  ;;  %1051 = vmatmul.mubr.msk.f32.vlgmr.msra.gmra.mrb[0].mxu0 %vm670_vm3, %v667_v11 }
 0x28f   : > { %1073 = vmatprep.subr.bf16.mxu1 %v1072_v10 }
 0x290   : > { %1075 = vmatpush3.bf16.msra.mxu1 %v1072_v10 }
 0x293   : > { %1058 = vmatmul.mubr.msk.f32.vlgmr.msra.gmra.mrb[0].mxu1 %vm670_vm3, %v667_v11 }
 0x360   : > { %v1052_v12 = vpop.f32.mrb[0].mxu0 }
 0x361   : > { %v743_v14 = vpop.f32.mrb[1].mxu0 }
 0x366   : > { %v1059_v13 = vpop.f32.mrb[0].mxu1 }
 0x367   : > { %v831_v15 = vsub.f32 %v1059_v13, %v1052_v12  ;;  %v821_v16 = vpop.f32.mrb[1].mxu1 }
 0x368   : > { %v830_v17 = vsub.f32 %v821_v16, %v743_v14 }
 0x369   : > { %v834_v18 = vmul.f32 1.442695, %v831_v15 }
 0x36a   : > { %v832_v19 = vmul.f32 1.442695, %v830_v17 }
 0x36b   : > { %1175 = vpow2.f32 %v834_v18 }
 0x36c   : > { %1177 = vpow2.f32 %v832_v19 }
 0x375   : > { %v1176_v20 = vpop.eup %1175 }
 0x376   : > { %v1178_v21 = vpop.eup %1177  ;;  %v837_v22 = vadd.f32 1.0, %v1176_v20 }
 0x377   : > { %v836_v23 = vadd.f32 1.0, %v1178_v21 }
 0x378   : > { %1179 = vrcp.f32 %v837_v22 }
 0x379   : > { %1181 = vrcp.f32 %v836_v23 }
 0x382   : > { %v1180_v24 = vpop.eup %1179 }
 0x383   : > { %v1182_v25 = vpop.eup %1181  ;;  %844 = vst.msk [vmem:[%s1381_s26 + $0x8] sm:$0xff] %vm842_vm4, %v1180_v24  ;;  %v846_v26 = vsub.f32 1.0, %v1180_v24 }
 0x384   : > { %843 = vst.msk [vmem:[%s1381_s26] sm:$0xff] %vm842_vm4, %v1182_v25  ;;  %v845_v27 = vsub.f32 1.0, %v1182_v25 }
 0x385   : > { %1008 = vst.msk [vmem:[%s1381_s26 + $0x18] sm:$0xff] %vm842_vm4, %v846_v26 }
 0x386   : > { %1007 = vst.msk [vmem:[%s1381_s26 + $0x10] sm:$0xff] %vm842_vm4, %v845_v27 }
 0x387   : > { %s1011_s18 = sshll.u32 %s1237_s19, 3  ;;  %s882_s9 = sshll.u32 %s1381_s26, 4  ;;  %s883_s9 = int_to_ptr.vmem [resolvable:$true] %s882_s9 }
 0x388   : > { %s863_s13 = sadd.s32 %s1011_s18, %s1368_s10  ;;  %s1260_s8 = smov 256  }
 0x389   : > { %s1012_s14 = sshll.u32 %s863_s13, 7  ;;  %1076 = sst [smem:[#allocation7]] (%p1343_p3), %s1260_s8 }
 0x38a   : > { %s865_s27 = scalar_lea.hbm %s1528_s4, %s1012_s14  ;;  %s1261_s30 = smov 512  }
 0x38b   : > { %1077 = sst [smem:[#allocation7 + $0x1]] (%p1343_p3), %s1261_s30  ;;  %s1262_s5 = smov 2  }
 0x38c   : > { %1078 = sst [smem:[#allocation7 + $0x2]] (%p1343_p3), %s1262_s5  ;;  %s1263_s19 = smov 128  }
 0x38d   : > { %1079 = sst [smem:[#allocation7 + $0x3]] (%p1343_p3), %s1263_s19  ;;  %s1264_s26 = smov 8  }
 0x38e   : > { %1080 = sst [smem:[#allocation7 + $0x4]] (%p1343_p3), %s1263_s19  ;;  %s1265_s10 = smov [#allocation6]  }
 0x38f   : > { %1081 = sst [smem:[#allocation7 + $0x5]] (%p1343_p3), %s1264_s26  ;;  %s1266_s11 = smov 0  }
 0x390   : > { %1082 = dma.general (%p1343_p3), %s883_s9, 512, %s865_s27, %s851_s6, %s1265_s10, [#allocation7], %s1266_s11, 0  }
 0x391 PF: > { %p1088_p1 = scmp.ge.s32.totalorder %s1249_s22, 2  ;;  %s910_s12 = sand.u32 1, %s1221_s15  }
 0x392   : > { %s911_s18 = scalar_lea.sflag [#allocation5], %s910_s12 }
 0x393   : > { %p1085_p2 = pnand %p1088_p1, %p1352_p8 }
 0x395   : > { %1216 = dma.done.wait (!%p1085_p2), %s911_s18, 512  }
 0x396   : > { %1218 = vsyncadd (!%p1085_p2), %s911_s18, 4294966784  ;;  %s17_s22 = sadd.s32 1, %s1249_s22   ;;  %s1533_s28 = sld [smem:[#allocation9_spill]] }
 0x397   : > { %p14_p4 = scmp.ge.s32.totalorder %s17_s22, 6   ;;  %s1534_s15 = smov %s1225_s16 }
 0x398   : > { %s1535_s16 = smov %s1229_s17  ;;  %s1536_s17 = smov %s1361_s7 }
 0x399   : > { %s1537_s18 = smov %s1241_s20  ;;  %s1538_s19 = smov %s1245_s21 }
 0x39a   : > { %s1539_s20 = smov %s1542_s25  ;;  %16 = sbr.rel (!%p14_p4) target bundleno = 5 (0x5), region = 87 }
 0x39c   : > { %s1540_s21 = smov %s1533_s28 }
 0x3a1   :  { %916 = vsyncpa [#allocation5], 1 }
 0x3a2   :  { %918 = vsyncpa [#allocation5 + $0x1], 1 }

</bundles_post_ra>
